<compile_context>
chip_gen: v7x
topology: tpu7x:2x2x1
jax: 0.10.0
libtpu: 0.0.40
codegen_flags: <defaults>
</compile_context>

<pallas_src>
import numpy as np
import jax
import jax.numpy as jnp
from jax import lax
from jax.experimental import pallas as pl
from jax.experimental.pallas import tpu as pltpu


# --------------------- fused main kernel (tiled over HW) --------------------

def _fused_kernel(x_ref, cw_ref, cb_ref, x0_ref, y0_ref, x1_ref, y1_ref,
                  row_ref, col_ref, lang_ref, padmask_ref,
                  feat_ref, logits_ref, scores_ref, bsum_ref):
    # --- backbone stand-in: 1x1 conv (matmul) + ReLU on this HW tile ---
    # TODO(synk): real Swin-T / FPN backbone is an external submodule; C is tiny
    # here so the K=C MXU pass is accepted (moot once a real backbone gives C>=128).
    feat = jnp.maximum(
        jnp.dot(x_ref[...], cw_ref[...], preferred_element_type=jnp.float32)
        + cb_ref[...], 0.0)                                       # (TM, D)
    feat_ref[...] = feat

    # --- extract_visual_prompt_feature: box mask @ feat matmul (partial sums) ---
    r = row_ref[...]                                              # (1, TM) int32
    c = col_ref[...]                                              # (1, TM) int32
    mask = ((r >= y0_ref[...]) & (r < y1_ref[...]) &
            (c >= x0_ref[...]) & (c < x1_ref[...])).astype(jnp.float32)  # (NB, TM)
    bsum_ref[...] = jnp.dot(mask, feat, preferred_element_type=jnp.float32)

    # --- VLDYHEAD fusion stand-in: VL dot-product logits, stored transposed ---
    # lang_ref already carries tanh(proj) * 1/sqrt(D) (scale folded in host-side);
    # only T_pad (~T) rows are written, lane-dense along the HW tile.
    logits_t = lax.dot_general(lang_ref[...], feat,
                               (((1,), (1,)), ((), ())),
                               preferred_element_type=jnp.float32)  # (T_pad, TM)
    logits_ref[...] = logits_t

    # --- score epilogue: sigmoid is monotonic => masked max over tokens FIRST ---
    masked = logits_t + padmask_ref[...]             # pad token rows -> -1e30
    smax = jnp.max(masked, axis=0, keepdims=True)    # (1, TM)
    scores_ref[...] = 1.0 / (1.0 + jnp.exp(-smax))   # one exp per pixel, not per token


def _pick_tile(hw):
    for t in (1024, 512, 256, 128):
        if hw % t == 0:
            return t
    # TODO(synk): odd FPN sizes need explicit row masking; fall back to one tile.
    return hw


def fused_main(x2d, conv_w, conv_b, x0, y0, x1, y1, row_ids, col_ids,
               lang_proj, padmask, *, tile_m=None):
    HW, C = x2d.shape
    D = conv_w.shape[1]
    T_pad = lang_proj.shape[0]
    NB = x0.shape[0]
    tile_m = tile_m or _pick_tile(HW)
    assert HW % tile_m == 0
    n_tiles = HW // tile_m

    # Constant, weight-like inputs: single-buffered (their block index never
    # changes), freeing VMEM so tile_m can grow on realistic shapes.
    buf1 = pl.Buffered(1)

    return pl.pallas_call(
        _fused_kernel,
        out_shape=(jax.ShapeDtypeStruct((HW, D), jnp.float32),          # feat2d
                   jax.ShapeDtypeStruct((T_pad, HW), jnp.float32),      # logits^T
                   jax.ShapeDtypeStruct((1, HW), jnp.float32),          # scores
                   jax.ShapeDtypeStruct((n_tiles, NB, D), jnp.float32)),  # box partials
        grid=(n_tiles,),
        in_specs=[pl.BlockSpec((tile_m, C), lambda i: (i, 0)),                   # x tile
                  pl.BlockSpec((C, D), lambda i: (0, 0), pipeline_mode=buf1),    # conv w
                  pl.BlockSpec((1, D), lambda i: (0, 0), pipeline_mode=buf1),    # conv b
                  pl.BlockSpec((NB, 1), lambda i: (0, 0), pipeline_mode=buf1),   # x0
                  pl.BlockSpec((NB, 1), lambda i: (0, 0), pipeline_mode=buf1),   # y0
                  pl.BlockSpec((NB, 1), lambda i: (0, 0), pipeline_mode=buf1),   # x1
                  pl.BlockSpec((NB, 1), lambda i: (0, 0), pipeline_mode=buf1),   # y1
                  pl.BlockSpec((1, tile_m), lambda i: (0, i)),                   # row ids
                  pl.BlockSpec((1, tile_m), lambda i: (0, i)),                   # col ids
                  pl.BlockSpec((T_pad, D), lambda i: (0, 0), pipeline_mode=buf1),  # lang feats
                  pl.BlockSpec((T_pad, 1), lambda i: (0, 0), pipeline_mode=buf1)],  # pad mask
        out_specs=(pl.BlockSpec((tile_m, D), lambda i: (i, 0)),
                   pl.BlockSpec((T_pad, tile_m), lambda i: (0, i)),
                   pl.BlockSpec((1, tile_m), lambda i: (0, i)),
                   pl.BlockSpec((None, NB, D), lambda i: (i, 0, 0))),
        # Every grid step is independent (no cross-step scratch), so "parallel"
        # shards the HW axis across both TensorCores on v7x.
        compiler_params=pltpu.CompilerParams(
            dimension_semantics=("parallel",)),
        # VMEM/step ~ 4B*tile_m*(C + D + T_pad + 1) streamed (double-buffered) plus
        # resident weights; far under scoped defaults at demo shapes.
        # TODO(synk): for realistic FPN sizes, raise tile_m and set vmem_limit_bytes
        # per generation (64 MiB physical on v7x, 128 MiB on v5e/v6e); bf16 operand
        # casts + bf16 feat2d/logits stores would further halve HBM traffic.
    )(x2d, conv_w, conv_b, x0, y0, x1, y1, row_ids, col_ids, lang_proj, padmask)


# ---------------------------------- forward ---------------------------------

def mq_glip_forward(images, positive_map_raw, input_ids, prompt_boxes,
                    conv_w, conv_b, emb_table, lang_w, lang_b,
                    vision_enabled=True, tile_m=None):
    B, C, H, W = images.shape
    assert B == 1  # vision_enabled path asserts batch 1, as in the reference
    D = conv_w.shape[1]
    HW = H * W
    T = int(input_ids.shape[0])
    T_pad = ((T + 7) // 8) * 8
    NB = prompt_boxes.shape[0]

    # host-side label -> token dict (plus=1 for VLDYHEAD), built from the RAW
    # positive map (normalization preserves the nonzero pattern) => no
    # device->host sync on any kernel output.
    pm_np = np.asarray(positive_map_raw)
    positive_map_label_to_token = {
        i + 1: np.nonzero(pm_np[i])[0].tolist() for i in range(pm_np.shape[0])}

    # --- create_positive_map normalization + create_attention_map ---
    # 8x256 elements: plain XLA (not worth a kernel launch, per perf review).
    positive_map = positive_map_raw / (
        jnp.sum(positive_map_raw, axis=-1, keepdims=True) + 1e-6)        # (L, 256)
    all_map = jnp.sum(positive_map, axis=0, keepdims=True)               # (1, 256)
    attn_mask = jnp.where(
        jnp.broadcast_to(all_map, (NB, all_map.shape[1])) != 0.0,
        1.0, 0.0).astype(jnp.float32)                                    # (NB, 256)

    # --- language backbone stand-in ---
    # TODO(synk): BERT language backbone not reproducible; embedding lookup + one
    # projection layer stand-in, computed once outside the per-tile pipeline with
    # 1/sqrt(D) folded in.  Padded token rows are exact zeros.
    lang_emb = jnp.take(emb_table, input_ids, axis=0)                    # (T, D)
    lang_proj = jnp.tanh(lang_emb @ lang_w + lang_b) * (1.0 / float(np.sqrt(D)))
    lang_proj = jnp.pad(lang_proj, ((0, T_pad - T), (0, 0)))             # (T_pad, D)
    padmask = jnp.where(jnp.arange(T_pad)[:, None] < T,
                        0.0, -1e30).astype(jnp.float32)                  # (T_pad, 1)

    # --- backbone input: NCHW -> NHWC -> (HW, C); precomputed flat coordinates ---
    x2d = jnp.transpose(images, (0, 2, 3, 1)).reshape(HW, C)
    row_ids = jnp.repeat(jnp.arange(H, dtype=jnp.int32), W)[None, :]     # (1, HW)
    col_ids = jnp.tile(jnp.arange(W, dtype=jnp.int32), H)[None, :]       # (1, HW)

    boxes = prompt_boxes.astype(jnp.int32).reshape(-1, 4)                # xyxy
    x0, y0 = boxes[:, 0:1], boxes[:, 1:2]
    x1, y1 = boxes[:, 2:3], boxes[:, 3:4]

    # --- fused backbone + box pooling + VL fusion + scores (single kernel) ---
    feat2d, logits_t, scores2d, box_partials = fused_main(
        x2d, conv_w, conv_b, x0, y0, x1, y1, row_ids, col_ids,
        lang_proj, padmask, tile_m=tile_m)

    logits = jnp.transpose(logits_t[:T, :])                              # (HW, T)
    scores = scores2d[0]                                                 # (HW,)

    # mean-pool finalize of per-tile partial sums (tiny XLA reduction); counts use
    # the identical half-open [x0,x1) x [y0,y1) feature-grid mask convention.
    # TODO(synk): verify against the reference ROI pooler (ROIAlign vs hard mask).
    box_sum = jnp.sum(box_partials, axis=0)                              # (NB, D)
    in_box = ((row_ids >= y0) & (row_ids < y1) &
              (col_ids >= x0) & (col_ids < x1))                          # (NB, HW)
    cnt = jnp.sum(in_box.astype(jnp.float32), axis=-1, keepdims=True)    # (NB, 1)
    query_feats = box_sum / jnp.maximum(cnt, 1.0)

    vision_inputs = {'vision': None, 'images': None,
                     'vision_attention_mask': None, 'batched_pos_category_map': None}
    if vision_enabled:
        vision_inputs = {
            'vision': query_feats[None, ...],                 # (1, NB, D)
            'images': feat2d[None, ...],                      # flatten_fpn_features stand-in
            'vision_attention_mask': attn_mask[None, ...],    # (1, NB, 256)
            'batched_pos_category_map': None,
        }

    return {
        'logits': logits,
        'scores': scores,
        'positive_map': positive_map,
        'label_to_token': positive_map_label_to_token,
        'vision_inputs': vision_inputs,
    }


# ----------------------------------- main ------------------------------------

if __name__ == "__main__":
    key = jax.random.PRNGKey(0)
    kimg, kw, kb, kemb, klw, klb = jax.random.split(key, 6)

    B, C, H, W = 1, 4, 16, 16       # NCHW like PyTorch (vision path needs B=1)
    D = 128                          # hidden dim, lane-dense (multiple of 128)
    T = 8                            # real text tokens
    L = 8                            # label phrases (rows of positive_map)
    TXT = 256                        # fixed text length in create_positive_map
    VOCAB = 64
    NB = 4                           # prompt boxes

    images = jax.random.normal(kimg, (B, C, H, W), jnp.float32)
    conv_w = jax.random.normal(kw, (C, D), jnp.float32) * 0.1
    conv_b = jax.random.normal(kb, (1, D), jnp.float32) * 0.1
    emb_table = jax.random.normal(kemb, (VOCAB, D), jnp.float32) * 0.1
    lang_w = jax.random.normal(klw, (D, D), jnp.float32) * 0.1
    lang_b = jax.random.normal(klb, (1, D), jnp.float32) * 0.1

    # synthetic "tokenization": deterministic token ids
    input_ids = (jnp.arange(T, dtype=jnp.int32) * 7 + 3) % VOCAB

    # deterministic binary positive map (char_to_token string logic is host glue):
    # label j is positive for tokens [4j, 4j+4)
    pm = np.zeros((L, TXT), np.float32)
    for j in range(L):
        pm[j, 4 * j:4 * j + 4] = 1.0
    positive_map_raw = jnp.asarray(pm)

    prompt_boxes = jnp.asarray([[0, 0, 8, 8],
                                [4, 4, 12, 12],
                                [8, 0, 16, 8],
                                [0, 8, 8, 16]], dtype=jnp.int32)  # xyxy, feat coords

    out = mq_glip_forward(images, positive_map_raw, input_ids, prompt_boxes,
                          conv_w, conv_b, emb_table, lang_w, lang_b,
                          vision_enabled=True)

    jax.block_until_ready((out['logits'], out['scores'], out['positive_map'],
                           out['vision_inputs']['vision'],
                           out['vision_inputs']['images'],
                           out['vision_inputs']['vision_attention_mask']))

    finite = (bool(jnp.all(jnp.isfinite(out['logits']))) and
              bool(jnp.all(jnp.isfinite(out['scores']))) and
              bool(jnp.all(jnp.isfinite(out['vision_inputs']['vision']))))
    assert finite
    print("KERNEL_OK")
</pallas_src>

<mosaic_0001>
module attributes {stable_mosaic.version = 11 : i64} {
  func.func @_fused_kernel(%arg0: i32, %arg1: memref<256x4xf32, #tpu.memory_space<vmem>>, %arg2: memref<4x128xf32, #tpu.memory_space<vmem>>, %arg3: memref<1x128xf32, #tpu.memory_space<vmem>>, %arg4: memref<4x1xi32, #tpu.memory_space<vmem>>, %arg5: memref<4x1xi32, #tpu.memory_space<vmem>>, %arg6: memref<4x1xi32, #tpu.memory_space<vmem>>, %arg7: memref<4x1xi32, #tpu.memory_space<vmem>>, %arg8: memref<1x256xi32, #tpu.memory_space<vmem>>, %arg9: memref<1x256xi32, #tpu.memory_space<vmem>>, %arg10: memref<8x128xf32, #tpu.memory_space<vmem>>, %arg11: memref<8x1xf32, #tpu.memory_space<vmem>>, %arg12: memref<256x128xf32, #tpu.memory_space<vmem>>, %arg13: memref<8x256xf32, #tpu.memory_space<vmem>>, %arg14: memref<1x256xf32, #tpu.memory_space<vmem>>, %arg15: memref<1x4x128xf32, #tpu.memory_space<vmem>>) attributes {dimension_semantics = [#tpu.dimension_semantics<parallel>], iteration_bounds = array<i64: 1>, scalar_prefetch = 0 : i64, scratch_operands = 0 : i64, tpu.core_type = #tpu.core_type<tc>, window_params = [{transform_indices = @transform_0, window_bounds = array<i64: 256, 4>}, {pipeline_mode = #tpu.pipeline_mode<synchronous>, transform_indices = @transform_1, window_bounds = array<i64: 4, 128>}, {pipeline_mode = #tpu.pipeline_mode<synchronous>, transform_indices = @transform_2, window_bounds = array<i64: 1, 128>}, {pipeline_mode = #tpu.pipeline_mode<synchronous>, transform_indices = @transform_3, window_bounds = array<i64: 4, 1>}, {pipeline_mode = #tpu.pipeline_mode<synchronous>, transform_indices = @transform_4, window_bounds = array<i64: 4, 1>}, {pipeline_mode = #tpu.pipeline_mode<synchronous>, transform_indices = @transform_5, window_bounds = array<i64: 4, 1>}, {pipeline_mode = #tpu.pipeline_mode<synchronous>, transform_indices = @transform_6, window_bounds = array<i64: 4, 1>}, {transform_indices = @transform_7, window_bounds = array<i64: 1, 256>}, {transform_indices = @transform_8, window_bounds = array<i64: 1, 256>}, {pipeline_mode = #tpu.pipeline_mode<synchronous>, transform_indices = @transform_9, window_bounds = array<i64: 8, 128>}, {pipeline_mode = #tpu.pipeline_mode<synchronous>, transform_indices = @transform_10, window_bounds = array<i64: 8, 1>}, {transform_indices = @transform_11, window_bounds = array<i64: 256, 128>}, {transform_indices = @transform_12, window_bounds = array<i64: 8, 256>}, {transform_indices = @transform_13, window_bounds = array<i64: 1, 256>}, {transform_indices = @transform_14, window_bounds = array<i64: 1, 4, 128>}]} {
    %c0 = arith.constant 0 : index
    %c0_0 = arith.constant 0 : index
    %0 = vector.load %arg1[%c0, %c0_0] : memref<256x4xf32, #tpu.memory_space<vmem>>, vector<256x4xf32>
    %c0_1 = arith.constant 0 : index
    %c0_2 = arith.constant 0 : index
    %1 = vector.load %arg2[%c0_1, %c0_2] : memref<4x128xf32, #tpu.memory_space<vmem>>, vector<4x128xf32>
    %cst = arith.constant dense<0.000000e+00> : vector<256x128xf32>
    %2 = tpu.matmul %0, %1, %cst {dimension_numbers = #tpu.dot_dimension_numbers<[1], [0], [0], [1], [0, 0, 1, 1], [], []>} : vector<256x4xf32>, vector<4x128xf32>, vector<256x128xf32> -> vector<256x128xf32>
    %c0_3 = arith.constant 0 : index
    %c0_4 = arith.constant 0 : index
    %3 = vector.load %arg3[%c0_3, %c0_4] : memref<1x128xf32, #tpu.memory_space<vmem>>, vector<1x128xf32>
    %4 = vector.broadcast %3 : vector<1x128xf32> to vector<256x128xf32>
    %5 = arith.addf %2, %4 : vector<256x128xf32>
    %cst_5 = arith.constant 0.000000e+00 : f32
    %6 = vector.broadcast %cst_5 : f32 to vector<256x128xf32>
    %7 = arith.maximumf %5, %6 : vector<256x128xf32>
    %c0_6 = arith.constant 0 : index
    %c0_7 = arith.constant 0 : index
    %8 = vector.load %arg12[%c0_6, %c0_7] : memref<256x128xf32, #tpu.memory_space<vmem>>, vector<256x128xf32>
    tpu.vector_store %arg12[%c0_6, %c0_7], %7 {strides = array<i32>} : memref<256x128xf32, #tpu.memory_space<vmem>>, vector<256x128xf32>,
    %c0_8 = arith.constant 0 : index
    %c0_9 = arith.constant 0 : index
    %9 = vector.load %arg8[%c0_8, %c0_9] : memref<1x256xi32, #tpu.memory_space<vmem>>, vector<1x256xi32>
    %c0_10 = arith.constant 0 : index
    %c0_11 = arith.constant 0 : index
    %10 = vector.load %arg9[%c0_10, %c0_11] : memref<1x256xi32, #tpu.memory_space<vmem>>, vector<1x256xi32>
    %c0_12 = arith.constant 0 : index
    %c0_13 = arith.constant 0 : index
    %11 = vector.load %arg5[%c0_12, %c0_13] : memref<4x1xi32, #tpu.memory_space<vmem>>, vector<4x1xi32>
    %12 = vector.broadcast %9 : vector<1x256xi32> to vector<4x256xi32>
    %13 = vector.broadcast %11 : vector<4x1xi32> to vector<4x256xi32>
    %14 = arith.cmpi sge, %12, %13 : vector<4x256xi32>
    %c0_14 = arith.constant 0 : index
    %c0_15 = arith.constant 0 : index
    %15 = vector.load %arg7[%c0_14, %c0_15] : memref<4x1xi32, #tpu.memory_space<vmem>>, vector<4x1xi32>
    %16 = vector.broadcast %9 : vector<1x256xi32> to vector<4x256xi32>
    %17 = vector.broadcast %15 : vector<4x1xi32> to vector<4x256xi32>
    %18 = arith.cmpi slt, %16, %17 : vector<4x256xi32>
    %19 = arith.andi %14, %18 : vector<4x256xi1>
    %c0_16 = arith.constant 0 : index
    %c0_17 = arith.constant 0 : index
    %20 = vector.load %arg4[%c0_16, %c0_17] : memref<4x1xi32, #tpu.memory_space<vmem>>, vector<4x1xi32>
    %21 = vector.broadcast %10 : vector<1x256xi32> to vector<4x256xi32>
    %22 = vector.broadcast %20 : vector<4x1xi32> to vector<4x256xi32>
    %23 = arith.cmpi sge, %21, %22 : vector<4x256xi32>
    %24 = arith.andi %19, %23 : vector<4x256xi1>
    %c0_18 = arith.constant 0 : index
    %c0_19 = arith.constant 0 : index
    %25 = vector.load %arg6[%c0_18, %c0_19] : memref<4x1xi32, #tpu.memory_space<vmem>>, vector<4x1xi32>
    %26 = vector.broadcast %10 : vector<1x256xi32> to vector<4x256xi32>
    %27 = vector.broadcast %25 : vector<4x1xi32> to vector<4x256xi32>
    %28 = arith.cmpi slt, %26, %27 : vector<4x256xi32>
    %29 = arith.andi %24, %28 : vector<4x256xi1>
    %30 = arith.extui %29 : vector<4x256xi1> to vector<4x256xi32>
    %31 = arith.sitofp %30 : vector<4x256xi32> to vector<4x256xf32>
    %cst_20 = arith.constant dense<0.000000e+00> : vector<4x128xf32>
    %32 = tpu.matmul %31, %7, %cst_20 {dimension_numbers = #tpu.dot_dimension_numbers<[1], [0], [0], [1], [0, 0, 1, 1], [], []>} : vector<4x256xf32>, vector<256x128xf32>, vector<4x128xf32> -> vector<4x128xf32>
    %c0_21 = arith.constant 0 : index
    %c0_22 = arith.constant 0 : index
    %c0_23 = arith.constant 0 : index
    %33 = vector.load %arg15[%c0_21, %c0_22, %c0_23] : memref<1x4x128xf32, #tpu.memory_space<vmem>>, vector<1x4x128xf32>
    %34 = vector.shape_cast %33 : vector<1x4x128xf32> to vector<4x128xf32>
    %35 = vector.shape_cast %32 : vector<4x128xf32> to vector<1x4x128xf32>
    tpu.vector_store %arg15[%c0_21, %c0_22, %c0_23], %35 {strides = array<i32>} : memref<1x4x128xf32, #tpu.memory_space<vmem>>, vector<1x4x128xf32>,
    %c0_24 = arith.constant 0 : index
    %c0_25 = arith.constant 0 : index
    %36 = vector.load %arg10[%c0_24, %c0_25] : memref<8x128xf32, #tpu.memory_space<vmem>>, vector<8x128xf32>
    %cst_26 = arith.constant dense<0.000000e+00> : vector<8x256xf32>
    %37 = tpu.matmul %36, %7, %cst_26 {dimension_numbers = #tpu.dot_dimension_numbers<[1], [1], [0], [0], [0, 0, 1, 0], [], []>} : vector<8x128xf32>, vector<256x128xf32>, vector<8x256xf32> -> vector<8x256xf32>
    %c0_27 = arith.constant 0 : index
    %c0_28 = arith.constant 0 : index
    %38 = vector.load %arg13[%c0_27, %c0_28] : memref<8x256xf32, #tpu.memory_space<vmem>>, vector<8x256xf32>
    tpu.vector_store %arg13[%c0_27, %c0_28], %37 {strides = array<i32>} : memref<8x256xf32, #tpu.memory_space<vmem>>, vector<8x256xf32>,
    %c0_29 = arith.constant 0 : index
    %c0_30 = arith.constant 0 : index
    %39 = vector.load %arg11[%c0_29, %c0_30] : memref<8x1xf32, #tpu.memory_space<vmem>>, vector<8x1xf32>
    %40 = vector.broadcast %39 : vector<8x1xf32> to vector<8x256xf32>
    %41 = arith.addf %37, %40 : vector<8x256xf32>
    %cst_31 = arith.constant dense<0xFF800000> : vector<256xf32>
    %42 = vector.multi_reduction <maximumf>, %41, %cst_31 [0] : vector<8x256xf32> to vector<256xf32>
    %43 = vector.shape_cast %42 : vector<256xf32> to vector<1x256xf32>
    %cst_32 = arith.constant 0.000000e+00 : f32
    %44 = vector.broadcast %cst_32 : f32 to vector<1x256xf32>
    %45 = arith.subf %44, %43 : vector<1x256xf32>
    %46 = math.exp %45 : vector<1x256xf32>
    %cst_33 = arith.constant 1.000000e+00 : f32
    %47 = vector.broadcast %cst_33 : f32 to vector<1x256xf32>
    %48 = arith.addf %47, %46 : vector<1x256xf32>
    %cst_34 = arith.constant 1.000000e+00 : f32
    %49 = vector.broadcast %cst_34 : f32 to vector<1x256xf32>
    %50 = arith.divf %49, %48 : vector<1x256xf32>
    %c0_35 = arith.constant 0 : index
    %c0_36 = arith.constant 0 : index
    %51 = vector.load %arg14[%c0_35, %c0_36] : memref<1x256xf32, #tpu.memory_space<vmem>>, vector<1x256xf32>
    tpu.vector_store %arg14[%c0_35, %c0_36], %50 {strides = array<i32>} : memref<1x256xf32, #tpu.memory_space<vmem>>, vector<1x256xf32>,
    return
  }
  func.func @transform_0(%arg0: i32) -> (i32, i32) {
    %c0_i32 = arith.constant 0 : i32
    %c0_i32_0 = arith.constant 0 : i32
    return %arg0, %c0_i32 : i32, i32
  }
  func.func @transform_1(%arg0: i32) -> (i32, i32) {
    %c0_i32 = arith.constant 0 : i32
    %c0_i32_0 = arith.constant 0 : i32
    %c0_i32_1 = arith.constant 0 : i32
    return %c0_i32, %c0_i32_0 : i32, i32
  }
  func.func @transform_2(%arg0: i32) -> (i32, i32) {
    %c0_i32 = arith.constant 0 : i32
    %c0_i32_0 = arith.constant 0 : i32
    %c0_i32_1 = arith.constant 0 : i32
    return %c0_i32, %c0_i32_0 : i32, i32
  }
  func.func @transform_3(%arg0: i32) -> (i32, i32) {
    %c0_i32 = arith.constant 0 : i32
    %c0_i32_0 = arith.constant 0 : i32
    %c0_i32_1 = arith.constant 0 : i32
    return %c0_i32, %c0_i32_0 : i32, i32
  }
  func.func @transform_4(%arg0: i32) -> (i32, i32) {
    %c0_i32 = arith.constant 0 : i32
    %c0_i32_0 = arith.constant 0 : i32
    %c0_i32_1 = arith.constant 0 : i32
    return %c0_i32, %c0_i32_0 : i32, i32
  }
  func.func @transform_5(%arg0: i32) -> (i32, i32) {
    %c0_i32 = arith.constant 0 : i32
    %c0_i32_0 = arith.constant 0 : i32
    %c0_i32_1 = arith.constant 0 : i32
    return %c0_i32, %c0_i32_0 : i32, i32
  }
  func.func @transform_6(%arg0: i32) -> (i32, i32) {
    %c0_i32 = arith.constant 0 : i32
    %c0_i32_0 = arith.constant 0 : i32
    %c0_i32_1 = arith.constant 0 : i32
    return %c0_i32, %c0_i32_0 : i32, i32
  }
  func.func @transform_7(%arg0: i32) -> (i32, i32) {
    %c0_i32 = arith.constant 0 : i32
    %c0_i32_0 = arith.constant 0 : i32
    return %c0_i32, %arg0 : i32, i32
  }
  func.func @transform_8(%arg0: i32) -> (i32, i32) {
    %c0_i32 = arith.constant 0 : i32
    %c0_i32_0 = arith.constant 0 : i32
    return %c0_i32, %arg0 : i32, i32
  }
  func.func @transform_9(%arg0: i32) -> (i32, i32) {
    %c0_i32 = arith.constant 0 : i32
    %c0_i32_0 = arith.constant 0 : i32
    %c0_i32_1 = arith.constant 0 : i32
    return %c0_i32, %c0_i32_0 : i32, i32
  }
  func.func @transform_10(%arg0: i32) -> (i32, i32) {
    %c0_i32 = arith.constant 0 : i32
    %c0_i32_0 = arith.constant 0 : i32
    %c0_i32_1 = arith.constant 0 : i32
    return %c0_i32, %c0_i32_0 : i32, i32
  }
  func.func @transform_11(%arg0: i32) -> (i32, i32) {
    %c0_i32 = arith.constant 0 : i32
    %c0_i32_0 = arith.constant 0 : i32
    return %arg0, %c0_i32 : i32, i32
  }
  func.func @transform_12(%arg0: i32) -> (i32, i32) {
    %c0_i32 = arith.constant 0 : i32
    %c0_i32_0 = arith.constant 0 : i32
    return %c0_i32, %arg0 : i32, i32
  }
  func.func @transform_13(%arg0: i32) -> (i32, i32) {
    %c0_i32 = arith.constant 0 : i32
    %c0_i32_0 = arith.constant 0 : i32
    return %c0_i32, %arg0 : i32, i32
  }
  func.func @transform_14(%arg0: i32) -> (i32, i32, i32) {
    %c0_i32 = arith.constant 0 : i32
    %c0_i32_0 = arith.constant 0 : i32
    %c0_i32_1 = arith.constant 0 : i32
    return %arg0, %c0_i32, %c0_i32_0 : i32, i32, i32
  }
}

</mosaic_0001>

<bundles_post_ra>
// kernel: tpu_custom_call.1
= control target key start
LH: loop header
LB: loop body
LE: loop exit
PB: predicated region body
PF: predicated region fallthrough
CT: control target
= control target key end

     0   :  { %20 = vsyncpa [#allocation3], 0  ;;  %s1544_s0 = inlined_call_operand.vmem [shape: f32[256,4], index: 0, kind: input, shape index: {}]   ;;  %s1545_s1 = inlined_call_operand.vmem [shape: f32[4,128], index: 1, kind: input, shape index: {}]   ;;  %s1546_s2 = inlined_call_operand.vmem [shape: f32[1,128], index: 2, kind: input, shape index: {}]   ;;  %s1547_s3 = inlined_call_operand.vmem [shape: s32[4,1], index: 3, kind: input, shape index: {}]   ;;  %s1548_s4 = inlined_call_operand.vmem [shape: s32[4,1], index: 4, kind: input, shape index: {}]   ;;  %s1549_s5 = inlined_call_operand.vmem [shape: s32[4,1], index: 5, kind: input, shape index: {}]   ;;  %s1550_s6 = inlined_call_operand.vmem [shape: s32[4,1], index: 6, kind: input, shape index: {}]   ;;  %s1551_s7 = inlined_call_operand.vmem [shape: s32[1,256], index: 7, kind: input, shape index: {}]   ;;  %s1552_s8 = inlined_call_operand.vmem [shape: s32[1,256], index: 8, kind: input, shape index: {}]   ;;  %s1553_s9 = inlined_call_operand.vmem [shape: f32[8,128], index: 9, kind: input, shape index: {}]   ;;  %s1554_s10 = inlined_call_operand.vmem [shape: f32[8,1], index: 10, kind: input, shape index: {}]   ;;  %s1555_s11 = inlined_call_operand.hbm [shape: f32[256,128], index: 11, kind: output, shape index: {0}]   ;;  %s1556_s12 = inlined_call_operand.hbm [shape: f32[8,256], index: 12, kind: output, shape index: {1}]   ;;  %s1557_s13 = inlined_call_operand.hbm [shape: f32[1,256], index: 13, kind: output, shape index: {2}]   ;;  %s1558_s14 = inlined_call_operand.hbm [shape: f32[1,4,128], index: 14, kind: output, shape index: {3}]  }
   0x1   :  { %21 = vsyncpa [#allocation5], 0  ;;  %v77_v0 = vld [vmem:[%s1545_s1] sm:$0xf]  ;;  %vm182_vm0 = vcmask 1043456   ;;  %vm85_vm1 = vcmask 31744  }
   0x2   :  { %v45_v1 = vld [vmem:[%s1544_s0] sm:$0xff]  ;;  %v46_v2 = vld [vmem:[%s1544_s0 + $0x8] sm:$0xff]  ;;  %924 = vmatprep.subr.msk.mxu0 %vm182_vm0, %v77_v0  ;;  %v47_v3 = vld [vmem:[%s1544_s0 + $0x10] sm:$0xff] }
   0x3   :  { %926 = vmatprep.mubr.msk.f32.mxu0 %vm85_vm1, %v45_v1  ;;  %925 = vmatpush3.msk.msra.mxu0 %vm182_vm0, %v77_v0  ;;  %v48_v4 = vld [vmem:[%s1544_s0 + $0x18] sm:$0xff]  ;;  %v49_v5 = vld [vmem:[%s1544_s0 + $0x20] sm:$0xff]  ;;  %v50_v6 = vld [vmem:[%s1544_s0 + $0x28] sm:$0xff] }
   0x4   :  { %927 = vmatmul.mubr.msk.f32.vlgmr.msra.gmra.mrb[0].mxu0 %vm85_vm1, %v46_v2  ;;  %v51_v7 = vld [vmem:[%s1544_s0 + $0x30] sm:$0xff] }
   0x5   :  { %929 = vmatprep.mubr.msk.f32.mxu0 %vm85_vm1, %v47_v3 }
   0x8   :  { %930 = vmatmul.mubr.msk.f32.gmra.mrb[2].mxu0 %vm85_vm1, %v48_v4 }
   0x9   :  { %932 = vmatprep.mubr.msk.f32.mxu0 %vm85_vm1, %v49_v5 }
   0xc   :  { %933 = vmatmul.mubr.msk.f32.gmra.mrb[4].mxu0 %vm85_vm1, %v50_v6 }
   0xd   :  { %22 = vsyncpa [#allocation8], 0  ;;  %935 = vmatprep.mubr.msk.f32.mxu0 %vm85_vm1, %v51_v7  ;;  %v52_v8 = vld [vmem:[%s1544_s0 + $0x38] sm:$0xff]  ;;  %v53_v9 = vld [vmem:[%s1544_s0 + $0x40] sm:$0xff]  ;;  %v1151_v33 = vmov 0   ;;  %v478_v40 = vlaneseq }
   0xe   :  { %v54_v10 = vld [vmem:[%s1544_s0 + $0x48] sm:$0xff]  ;;  %v55_v11 = vld [vmem:[%s1544_s0 + $0x50] sm:$0xff]  ;;  %v56_v12 = vld [vmem:[%s1544_s0 + $0x58] sm:$0xff]  ;;  %1047 = vset.pattern.permute.xlu0 %v1151_v33  ;;  %1048 = vset.pattern.permute.xlu1 %v1151_v33 }
   0xf   :  { %v57_v13 = vld [vmem:[%s1544_s0 + $0x60] sm:$0xff]  ;;  %v58_v14 = vld [vmem:[%s1544_s0 + $0x68] sm:$0xff]  ;;  %v59_v15 = vld [vmem:[%s1544_s0 + $0x70] sm:$0xff]  ;;  %v1393_v42 = vshrl.u32 %v478_v40, 7 }
  0x10   :  { %936 = vmatmul.mubr.msk.f32.gmra.mrb[6].mxu0 %vm85_vm1, %v52_v8  ;;  %v60_v16 = vld [vmem:[%s1544_s0 + $0x78] sm:$0xff]  ;;  %v61_v17 = vld [vmem:[%s1544_s0 + $0x80] sm:$0xff]  ;;  %v62_v18 = vld [vmem:[%s1544_s0 + $0x88] sm:$0xff] }
  0x11   :  { %938 = vmatprep.mubr.msk.f32.mxu0 %vm85_vm1, %v53_v9  ;;  %v63_v19 = vld [vmem:[%s1544_s0 + $0x90] sm:$0xff]  ;;  %v64_v20 = vld [vmem:[%s1544_s0 + $0x98] sm:$0xff]  ;;  %v65_v21 = vld [vmem:[%s1544_s0 + $0xa0] sm:$0xff]  ;;  %v484_v47 = vsub.s32 1, %v1393_v42 }
  0x12   :  { %v66_v22 = vld [vmem:[%s1544_s0 + $0xa8] sm:$0xff]  ;;  %v67_v23 = vld [vmem:[%s1544_s0 + $0xb0] sm:$0xff]  ;;  %v68_v24 = vld [vmem:[%s1544_s0 + $0xb8] sm:$0xff] }
  0x13   :  { %v69_v25 = vld [vmem:[%s1544_s0 + $0xc0] sm:$0xff]  ;;  %v70_v26 = vld [vmem:[%s1544_s0 + $0xc8] sm:$0xff]  ;;  %v71_v27 = vld [vmem:[%s1544_s0 + $0xd0] sm:$0xff] }
  0x14   :  { %939 = vmatmul.mubr.msk.f32.gmra.mrb[8].mxu0 %vm85_vm1, %v54_v10  ;;  %v72_v28 = vld [vmem:[%s1544_s0 + $0xd8] sm:$0xff]  ;;  %v73_v29 = vld [vmem:[%s1544_s0 + $0xe0] sm:$0xff]  ;;  %v74_v30 = vld [vmem:[%s1544_s0 + $0xe8] sm:$0xff] }
  0x15   :  { %941 = vmatprep.mubr.msk.f32.mxu0 %vm85_vm1, %v55_v11  ;;  %v75_v31 = vld [vmem:[%s1544_s0 + $0xf0] sm:$0xff]  ;;  %v76_v32 = vld [vmem:[%s1544_s0 + $0xf8] sm:$0xff]  ;;  %v477_v34 = vld [vmem:[%s1548_s4] sm:$0xf] }
  0x16   :  { %487 = vperm.xlu0 %1047, %v477_v34   ;;  %v499_v35 = vld [vmem:[%s1547_s3] sm:$0xf] }
  0x17   :  { %v491_v36 = vld [vmem:[%s1550_s6] sm:$0xf]  ;;  %509 = vperm.xlu1 %1048, %v499_v35  }
  0x18   :  { %942 = vmatmul.mubr.msk.f32.gmra.mrb[10].mxu0 %vm85_vm1, %v56_v12  ;;  %v515_v37 = vld [vmem:[%s1549_s5] sm:$0xf] }
  0x19   :  { %944 = vmatprep.mubr.msk.f32.mxu0 %vm85_vm1, %v57_v13  ;;  %v672_v38 = vld [vmem:[%s1554_s10] sm:$0xff] }
  0x1a   :  { %493 = vperm.xlu0 %1047, %v491_v36   ;;  %v1384_v39 = vld [vmem:[%s1553_s9] sm:$0xff] }
  0x1b   :  { %517 = vperm.xlu1 %1048, %v515_v37   ;;  %v1390_v41 = vld [vmem:[%s1546_s2] ss:$0 sm:$0xff] }
  0x1c   :  { %945 = vmatmul.mubr.msk.f32.gmra.mrb[12].mxu0 %vm85_vm1, %v58_v14  ;;  %v1401_v49 = vld [vmem:[%s1551_s7] sm:$0x3]  ;;  %s1153_s7 = smov [#allocation2]  }
  0x1d   :  { %947 = vmatprep.mubr.msk.f32.mxu0 %vm85_vm1, %v59_v15  ;;  %v1409_v55 = vld [vmem:[%s1552_s8] sm:$0x3]  ;;  %v485_v58 = vrot.slane %v1401_v49, %v484_v47  ;;  %s732_s8 = sshll.u32 %s1153_s7, 4  ;;  %s733_s8 = int_to_ptr.vmem [resolvable:$true] %s732_s8 }
  0x1e   :  { %675 = vperm.xlu0 %1047, %v672_v38   ;;  %v507_v63 = vrot.slane %v1409_v55, %v484_v47  ;;  %s1057_s1 = scalar_lea.vmem %s733_s8, 4096  ;;  %p1062_p1 = scmp.lt.s32.totalorder %s733_s8, %s733_s8 }
  0x1f   :  { %p1058_p0 = scmp.ne.s32.totalorder %s733_s8, %s1057_s1  ;;  %p1063_p2 = scmp.lt.s32.totalorder %s1057_s1, %s1057_s1 }
  0x20   :  { %948 = vmatmul.mubr.msk.f32.gmra.mrb[14].mxu0 %vm85_vm1, %v60_v16 }
  0x21   :  { %950 = vmatprep.mubr.msk.f32.mxu0 %vm85_vm1, %v61_v17  ;;  %p1064_p3 = por %p1063_p2, %p1062_p1 }
  0x23   :  { %p1065_p4 = pnand %p1064_p3, %p1058_p0 }
  0x24   :  { %951 = vmatmul.mubr.msk.f32.gmra.mrb[16].mxu0 %vm85_vm1, %v62_v18  ;;  %v1152_v18 = vmov 1.0  }
  0x25   :  { %953 = vmatprep.mubr.msk.f32.mxu0 %vm85_vm1, %v63_v19 }
  0x28   :  { %954 = vmatmul.mubr.msk.f32.gmra.mrb[18].mxu0 %vm85_vm1, %v64_v20 }
  0x29   :  { %956 = vmatprep.mubr.msk.f32.mxu0 %vm85_vm1, %v65_v21 }
  0x2c   :  { %957 = vmatmul.mubr.msk.f32.gmra.mrb[20].mxu0 %vm85_vm1, %v66_v22 }
  0x2d   :  { %959 = vmatprep.mubr.msk.f32.mxu0 %vm85_vm1, %v67_v23 }
  0x30   :  { %960 = vmatmul.mubr.msk.f32.gmra.mrb[22].mxu0 %vm85_vm1, %v68_v24 }
  0x31   :  { %962 = vmatprep.mubr.msk.f32.mxu0 %vm85_vm1, %v69_v25 }
  0x34   :  { %963 = vmatmul.mubr.msk.f32.gmra.mrb[24].mxu0 %vm85_vm1, %v70_v26 }
  0x35   :  { %965 = vmatprep.mubr.msk.f32.mxu0 %vm85_vm1, %v71_v27 }
  0x38   :  { %966 = vmatmul.mubr.msk.f32.gmra.mrb[26].mxu0 %vm85_vm1, %v72_v28 }
  0x39   :  { %968 = vmatprep.mubr.msk.f32.mxu0 %vm85_vm1, %v73_v29 }
  0x3c   :  { %969 = vmatmul.mubr.msk.f32.gmra.mrb[28].mxu0 %vm85_vm1, %v74_v30 }
  0x3d   :  { %971 = vmatprep.mubr.msk.f32.mxu0 %vm85_vm1, %v75_v31 }
  0x40   :  { %972 = vmatmul.mubr.msk.f32.gmra.mrb[30].mxu0 %vm85_vm1, %v76_v32 }
  0x41   :  { %922 = vmatprep.mubr.f32.mxu0 %v1384_v39 }
  0x95   :  { %v1403_v52 = vpop.permute.xlu0 %487 }
  0x96   :  { %v1415_v62 = vpop.permute.xlu1 %509  ;;  %vm490_vm2 = vcmp.ge.s32.totalorder %v485_v58, %v1403_v52 }
  0x97   :  { %vm512_vm4 = vcmp.ge.s32.totalorder %v507_v63, %v1415_v62 }
  0x99   :  { %v1419_v2 = vpop.permute.xlu0 %493 }
  0x9a   :  { %vm496_vm3 = vcmp.lt.s32.totalorder %v485_v58, %v1419_v2  ;;  %v1427_v8 = vpop.permute.xlu1 %517 }
  0x9b   :  { %vm520_vm5 = vcmp.lt.s32.totalorder %v507_v63, %v1427_v8  ;;  %vm498_vm6 = vmand %vm490_vm2, %vm496_vm3 }
  0x9c   :  { %vm514_vm7 = vmand %vm498_vm6, %vm512_vm4 }
  0x9d   :  { %vm522_vm8 = vmand %vm514_vm7, %vm520_vm5 }
  0x9e   :  { %820 = vmatprep.mubr.msk.f32.mxu1 %vm522_vm8, %v1152_v18 }
  0xd7   :  { %v928_v43 = vpop.f32.mrb[0].mxu0 }
  0xd8   :  { %v258_v44 = vadd.f32 %v928_v43, %v1390_v41  ;;  %v252_v45 = vpop.f32.mrb[1].mxu0 }
  0xd9   :  { %v253_v46 = vadd.f32 %v1390_v41, %v252_v45 }
  0xda   :  { %v412_v48 = vmax.f32 %v258_v44, 0.0 }
  0xdb   :  { %v411_v50 = vmax.f32 %v253_v46, 0.0  ;;  %v931_v51 = vpop.f32.mrb[2].mxu0 }
  0xdc   :  { %444 = vst [vmem:[#allocation2 + $0x8] sm:$0xff] %v412_v48  ;;  %v268_v53 = vadd.f32 %v931_v51, %v1390_v41  ;;  %v262_v54 = vpop.f32.mrb[3].mxu0 }
  0xdd   :  { %443 = vst [vmem:[#allocation2] sm:$0xff] %v411_v50  ;;  %v263_v56 = vadd.f32 %v1390_v41, %v262_v54  ;;  %v1412_v57 = vpack.c.bf16 %v412_v48, %v411_v50 }
  0xde   :  { %v414_v59 = vmax.f32 %v268_v53, 0.0 }
  0xdf   :  { %v413_v60 = vmax.f32 %v263_v56, 0.0  ;;  %v934_v61 = vpop.f32.mrb[4].mxu0 }
  0xe0   :  { %446 = vst [vmem:[#allocation2 + $0x18] sm:$0xff] %v414_v59  ;;  %v278_v0 = vadd.f32 %v934_v61, %v1390_v41  ;;  %v272_v1 = vpop.f32.mrb[5].mxu0 }
  0xe1   :  { %445 = vst [vmem:[#allocation2 + $0x10] sm:$0xff] %v413_v60  ;;  %v1421_v3 = vpack.c.bf16 %v414_v59, %v413_v60  ;;  %v273_v4 = vadd.f32 %v1390_v41, %v272_v1 }
  0xe2   :  { %v416_v5 = vmax.f32 %v278_v0, 0.0 }
  0xe3   :  { %v415_v6 = vmax.f32 %v273_v4, 0.0  ;;  %v937_v7 = vpop.f32.mrb[6].mxu0 }
  0xe4   :  { %448 = vst [vmem:[#allocation2 + $0x28] sm:$0xff] %v416_v5  ;;  %v288_v9 = vadd.f32 %v937_v7, %v1390_v41  ;;  %v282_v10 = vpop.f32.mrb[7].mxu0 }
  0xe5   :  { %447 = vst [vmem:[#allocation2 + $0x20] sm:$0xff] %v415_v6  ;;  %v1431_v11 = vpack.c.bf16 %v416_v5, %v415_v6  ;;  %v283_v12 = vadd.f32 %v1390_v41, %v282_v10 }
  0xe6   :  { %v418_v13 = vmax.f32 %v288_v9, 0.0 }
  0xe7   :  { %v417_v14 = vmax.f32 %v283_v12, 0.0  ;;  %v940_v15 = vpop.f32.mrb[8].mxu0 }
  0xe8   :  { %450 = vst [vmem:[#allocation2 + $0x38] sm:$0xff] %v418_v13  ;;  %v298_v16 = vadd.f32 %v940_v15, %v1390_v41  ;;  %v292_v17 = vpop.f32.mrb[9].mxu0 }
  0xe9   :  { %449 = vst [vmem:[#allocation2 + $0x30] sm:$0xff] %v417_v14  ;;  %v1436_v19 = vpack.c.bf16 %v418_v13, %v417_v14  ;;  %v293_v20 = vadd.f32 %v1390_v41, %v292_v17 }
  0xea   :  { %v420_v21 = vmax.f32 %v298_v16, 0.0 }
  0xeb   :  { %v419_v22 = vmax.f32 %v293_v20, 0.0  ;;  %v943_v23 = vpop.f32.mrb[10].mxu0 }
  0xec   :  { %452 = vst [vmem:[#allocation2 + $0x48] sm:$0xff] %v420_v21  ;;  %v308_v24 = vadd.f32 %v943_v23, %v1390_v41  ;;  %v302_v25 = vpop.f32.mrb[11].mxu0 }
  0xed   :  { %451 = vst [vmem:[#allocation2 + $0x40] sm:$0xff] %v419_v22  ;;  %v1440_v26 = vpack.c.bf16 %v420_v21, %v419_v22  ;;  %v303_v27 = vadd.f32 %v1390_v41, %v302_v25 }
  0xee   :  { %v422_v28 = vmax.f32 %v308_v24, 0.0 }
  0xef   :  { %v421_v29 = vmax.f32 %v303_v27, 0.0  ;;  %v946_v30 = vpop.f32.mrb[12].mxu0 }
  0xf0   :  { %454 = vst [vmem:[#allocation2 + $0x58] sm:$0xff] %v422_v28  ;;  %v318_v31 = vadd.f32 %v946_v30, %v1390_v41  ;;  %v312_v32 = vpop.f32.mrb[13].mxu0 }
  0xf1   :  { %453 = vst [vmem:[#allocation2 + $0x50] sm:$0xff] %v421_v29  ;;  %v1444_v33 = vpack.c.bf16 %v422_v28, %v421_v29  ;;  %v313_v34 = vadd.f32 %v1390_v41, %v312_v32 }
  0xf2   :  { %v424_v35 = vmax.f32 %v318_v31, 0.0  ;;  %v480_v31 = vsub.s32 0, %v1393_v42 }
  0xf3   :  { %v423_v36 = vmax.f32 %v313_v34, 0.0  ;;  %v949_v37 = vpop.f32.mrb[14].mxu0 }
  0xf4   :  { %456 = vst [vmem:[#allocation2 + $0x68] sm:$0xff] %v424_v35  ;;  %v328_v38 = vadd.f32 %v949_v37, %v1390_v41  ;;  %v322_v43 = vpop.f32.mrb[15].mxu0 }
  0xf5   :  { %455 = vst [vmem:[#allocation2 + $0x60] sm:$0xff] %v423_v36  ;;  %v1448_v44 = vpack.c.bf16 %v424_v35, %v423_v36  ;;  %v323_v45 = vadd.f32 %v1390_v41, %v322_v43  ;;  %v481_v43 = vrot.slane %v1401_v49, %v480_v31 }
  0xf6   :  { %v426_v46 = vmax.f32 %v328_v38, 0.0 }
  0xf7   :  { %v425_v47 = vmax.f32 %v323_v45, 0.0  ;;  %v952_v48 = vpop.f32.mrb[16].mxu0  ;;  %vm489_vm9 = vcmp.ge.s32.totalorder %v481_v43, %v1403_v52  ;;  %vm495_vm10 = vcmp.lt.s32.totalorder %v481_v43, %v1419_v2 }
  0xf8   :  { %458 = vst [vmem:[#allocation2 + $0x78] sm:$0xff] %v426_v46  ;;  %v338_v50 = vadd.f32 %v952_v48, %v1390_v41  ;;  %v332_v51 = vpop.f32.mrb[17].mxu0  ;;  %vm497_vm12 = vmand %vm489_vm9, %vm495_vm10 }
  0xf9   :  { %457 = vst [vmem:[#allocation2 + $0x70] sm:$0xff] %v425_v47  ;;  %v1452_v53 = vpack.c.bf16 %v426_v46, %v425_v47  ;;  %v333_v54 = vadd.f32 %v1390_v41, %v332_v51  ;;  %v503_v51 = vrot.slane %v1409_v55, %v480_v31 }
  0xfa   :  { %v428_v56 = vmax.f32 %v338_v50, 0.0 }
  0xfb   :  { %v427_v58 = vmax.f32 %v333_v54, 0.0  ;;  %v955_v59 = vpop.f32.mrb[18].mxu0  ;;  %vm511_vm11 = vcmp.ge.s32.totalorder %v503_v51, %v1415_v62  ;;  %vm519_vm14 = vcmp.lt.s32.totalorder %v503_v51, %v1427_v8 }
  0xfc   :  { %460 = vst [vmem:[#allocation2 + $0x88] sm:$0xff] %v428_v56  ;;  %v348_v60 = vadd.f32 %v955_v59, %v1390_v41  ;;  %v342_v61 = vpop.f32.mrb[19].mxu0  ;;  %vm513_vm13 = vmand %vm497_vm12, %vm511_vm11 }
  0xfd   :  { %459 = vst [vmem:[#allocation2 + $0x80] sm:$0xff] %v427_v58  ;;  %v343_v63 = vadd.f32 %v1390_v41, %v342_v61  ;;  %v974_v0 = vpack.c.bf16 %v428_v56, %v427_v58  ;;  %vm521_vm15 = vmand %vm513_vm13, %vm519_vm14 }
  0xfe   :  { %v430_v1 = vmax.f32 %v348_v60, 0.0 }
  0xff   :  { %v429_v4 = vmax.f32 %v343_v63, 0.0  ;;  %v958_v5 = vpop.f32.mrb[20].mxu0  ;;  %975 = vmatprep.subr.bf16.mxu1 %v974_v0  ;;  %1007 = vmatprep.subr.bf16.mxu0 %v974_v0 }
 0x100   :  { %462 = vst [vmem:[#allocation2 + $0x98] sm:$0xff] %v430_v1  ;;  %v358_v6 = vadd.f32 %v958_v5, %v1390_v41  ;;  %v352_v7 = vpop.f32.mrb[21].mxu0  ;;  %977 = vmatpush3.bf16.msra.mxu1 %v1412_v57  ;;  %1009 = vmatpush3.bf16.xpose.msra.mxu0 %v1412_v57 }
 0x101   :  { %461 = vst [vmem:[#allocation2 + $0x90] sm:$0xff] %v429_v4  ;;  %v978_v9 = vpack.c.bf16 %v430_v1, %v429_v4  ;;  %v353_v10 = vadd.f32 %v1390_v41, %v352_v7 }
 0x102   :  { %v432_v12 = vmax.f32 %v358_v6, 0.0 }
 0x103   :  { %v431_v13 = vmax.f32 %v353_v10, 0.0  ;;  %v961_v14 = vpop.f32.mrb[22].mxu0  ;;  %979 = vmatprep.subr.bf16.mxu1 %v978_v9  ;;  %1011 = vmatprep.subr.bf16.mxu0 %v978_v9 }
 0x104   :  { %464 = vst [vmem:[#allocation2 + $0xa8] sm:$0xff] %v432_v12  ;;  %v368_v15 = vadd.f32 %v961_v14, %v1390_v41  ;;  %v362_v16 = vpop.f32.mrb[23].mxu0  ;;  %981 = vmatpush3.bf16.msra.mxu1 %v1421_v3 }
 0x105   :  { %463 = vst [vmem:[#allocation2 + $0xa0] sm:$0xff] %v431_v13  ;;  %v982_v17 = vpack.c.bf16 %v432_v12, %v431_v13  ;;  %v363_v20 = vadd.f32 %v1390_v41, %v362_v16 }
 0x106   :  { %v434_v57 = vmax.f32 %v368_v15, 0.0 }
 0x107   :  { %v433_v21 = vmax.f32 %v363_v20, 0.0  ;;  %v964_v22 = vpop.f32.mrb[24].mxu0  ;;  %983 = vmatprep.subr.bf16.mxu1 %v982_v17 }
 0x108   :  { %466 = vst [vmem:[#allocation2 + $0xb8] sm:$0xff] %v434_v57  ;;  %v378_v23 = vadd.f32 %v964_v22, %v1390_v41  ;;  %v372_v24 = vpop.f32.mrb[25].mxu0  ;;  %985 = vmatpush3.bf16.msra.mxu1 %v1431_v11  ;;  %1013 = vmatpush3.bf16.xpose.msra.mxu0 %v1421_v3 }
 0x109   :  { %465 = vst [vmem:[#allocation2 + $0xb0] sm:$0xff] %v433_v21  ;;  %v986_v25 = vpack.c.bf16 %v434_v57, %v433_v21  ;;  %v373_v27 = vadd.f32 %v1390_v41, %v372_v24  ;;  %1015 = vmatprep.subr.bf16.mxu0 %v982_v17 }
 0x10a   :  { %v436_v28 = vmax.f32 %v378_v23, 0.0 }
 0x10b   :  { %v435_v29 = vmax.f32 %v373_v27, 0.0  ;;  %v967_v30 = vpop.f32.mrb[26].mxu0  ;;  %987 = vmatprep.subr.bf16.mxu1 %v986_v25 }
 0x10c   :  { %468 = vst [vmem:[#allocation2 + $0xc8] sm:$0xff] %v436_v28  ;;  %v388_v32 = vadd.f32 %v967_v30, %v1390_v41  ;;  %v382_v34 = vpop.f32.mrb[27].mxu0  ;;  %989 = vmatpush3.bf16.msra.mxu1 %v1436_v19 }
 0x10d   :  { %467 = vst [vmem:[#allocation2 + $0xc0] sm:$0xff] %v435_v29  ;;  %v990_v35 = vpack.c.bf16 %v436_v28, %v435_v29  ;;  %v383_v3 = vadd.f32 %v1390_v41, %v382_v34 }
 0x10e   :  { %v438_v36 = vmax.f32 %v388_v32, 0.0 }
 0x10f   :  { %v437_v37 = vmax.f32 %v383_v3, 0.0  ;;  %v970_v38 = vpop.f32.mrb[28].mxu0  ;;  %991 = vmatprep.subr.bf16.mxu1 %v990_v35 }
 0x110   :  { %470 = vst [vmem:[#allocation2 + $0xd8] sm:$0xff] %v438_v36  ;;  %v398_v45 = vadd.f32 %v970_v38, %v1390_v41  ;;  %v392_v46 = vpop.f32.mrb[29].mxu0  ;;  %993 = vmatpush3.bf16.msra.mxu1 %v1440_v26  ;;  %1017 = vmatpush3.bf16.xpose.msra.mxu0 %v1431_v11 }
 0x111   :  { %469 = vst [vmem:[#allocation2 + $0xd0] sm:$0xff] %v437_v37  ;;  %v994_v47 = vpack.c.bf16 %v438_v36, %v437_v37  ;;  %v393_v48 = vadd.f32 %v1390_v41, %v392_v46  ;;  %1019 = vmatprep.subr.bf16.mxu0 %v986_v25 }
 0x112   :  { %v440_v50 = vmax.f32 %v398_v45, 0.0 }
 0x113   :  { %v439_v54 = vmax.f32 %v393_v48, 0.0  ;;  %v973_v56 = vpop.f32.mrb[30].mxu0  ;;  %995 = vmatprep.subr.bf16.mxu1 %v994_v47 }
 0x114   :  { %472 = vst [vmem:[#allocation2 + $0xe8] sm:$0xff] %v440_v50  ;;  %v408_v49 = vadd.f32 %v973_v56, %v1390_v41  ;;  %v402_v58 = vpop.f32.mrb[31].mxu0  ;;  %997 = vmatpush3.bf16.msra.mxu1 %v1444_v33 }
 0x115   :  { %471 = vst [vmem:[#allocation2 + $0xe0] sm:$0xff] %v439_v54  ;;  %v998_v11 = vpack.c.bf16 %v440_v50, %v439_v54  ;;  %v403_v59 = vadd.f32 %v1390_v41, %v402_v58 }
 0x116   :  { %v442_v60 = vmax.f32 %v408_v49, 0.0 }
 0x117   :  { %v441_v55 = vmax.f32 %v403_v59, 0.0  ;;  %999 = vmatprep.subr.bf16.mxu1 %v998_v11 }
 0x118   :  { %474 = vst [vmem:[#allocation2 + $0xf8] sm:$0xff] %v442_v60  ;;  %1001 = vmatpush3.bf16.msra.mxu1 %v1448_v44  ;;  %1021 = vmatpush3.bf16.xpose.msra.mxu0 %v1436_v19 }
 0x119   :  { %473 = vst [vmem:[#allocation2 + $0xf0] sm:$0xff] %v441_v55  ;;  %v1002_v52 = vpack.c.bf16 %v442_v60, %v441_v55  ;;  %1023 = vmatprep.subr.bf16.mxu0 %v990_v35 }
 0x11b   :  { %1003 = vmatprep.subr.bf16.mxu1 %v1002_v52 }
 0x11c   :  { %1005 = vmatpush3.bf16.msra.mxu1 %v1452_v53 }
 0x11f   :  { %821 = vmatmul.mubr.msk.f32.vlgmr.msra.gmra.mrb[0].mxu1 %vm521_vm15, %v1152_v18 }
 0x120   :  { %1025 = vmatpush3.bf16.xpose.msra.mxu0 %v1440_v26 }
 0x121   :  { %1027 = vmatprep.subr.bf16.mxu0 %v994_v47 }
 0x128   :  { %1029 = vmatpush3.bf16.xpose.msra.mxu0 %v1444_v33 }
 0x129   :  { %1031 = vmatprep.subr.bf16.mxu0 %v998_v11 }
 0x130   :  { %1033 = vmatpush3.bf16.xpose.msra.mxu0 %v1448_v44 }
 0x131   :  { %1035 = vmatprep.subr.bf16.mxu0 %v1002_v52 }
 0x138   :  { %1037 = vmatpush3.bf16.xpose.msra.mxu0 %v1452_v53 }
 0x13f   :  { %923 = vmatmul.mubr.f32.vlgmr.msra.gmra.mrb[32].mxu0 %v1384_v39 }
 0x140   :  { %1068 = shalt.err (!%p1065_p4)
}
 0x141   :  { %s1069_s23 = scalar_lea.hbm %s1555_s11, 4096 }
 0x142   :  { %p1070_p5 = scmp.ne.s32.totalorder %s1555_s11, %s1069_s23  ;;  %p1073_p6 = scmp.lt.u32.totalorder %s1069_s23, %s1555_s11 }
 0x144   :  { %p1075_p7 = pnand %p1073_p6, %p1070_p5 }
 0x146   :  { %1078 = shalt.err (!%p1075_p7)
}
 0x147   :  { %s1154_s28 = smov 128   ;;  %s1155_s29 = smov 8  }
 0x148   :  { %738 = dma.vmem_to_hbm [thread:$0]  %s733_s8, 4096, %s1555_s11, [#allocation3], %s1154_s28, %s1154_s28, %s1155_s29  }
 0x149   :  { %s1156_s16 = smov [#allocation7]  }
 0x14a   :  { %s765_s0 = sshll.u32 %s1156_s16, 4  ;;  %s766_s0 = int_to_ptr.vmem [resolvable:$true] %s765_s0 }
 0x14b   :  { %s1079_s17 = scalar_lea.vmem %s766_s0, 64  ;;  %p1084_p9 = scmp.lt.s32.totalorder %s766_s0, %s766_s0 }
 0x14c   :  { %p1080_p8 = scmp.ne.s32.totalorder %s766_s0, %s1079_s17  ;;  %p1085_p10 = scmp.lt.s32.totalorder %s1079_s17, %s1079_s17 }
 0x14e   :  { %p1086_p11 = por %p1085_p10, %p1084_p9 }
 0x150   :  { %p1087_p12 = pnand %p1086_p11, %p1080_p8 }
 0x1f2   :  { %v887_v39 = vpop.f32.mrb[0].mxu1 }
 0x1f3   :  { %v888_v41 = vpop.f32.mrb[1].mxu1 }
 0x1f4   :  { %v889_v62 = vadd.f32 %v888_v41, %v887_v39 }
 0x1f6   :  { %597 = vst [vmem:[#allocation7] sm:$0xf] %v889_v62 }
 0x1f7   :  { %1090 = shalt.err (!%p1087_p12)
}
 0x1f8   :  { %s1091_s4 = scalar_lea.hbm %s1558_s14, 64 }
 0x1f9   :  { %p1092_p13 = scmp.ne.s32.totalorder %s1558_s14, %s1091_s4  ;;  %p1095_p0 = scmp.lt.u32.totalorder %s1091_s4, %s1558_s14 }
 0x1fb   :  { %p1097_p1 = pnand %p1095_p0, %p1092_p13 }
 0x1fd   :  { %1100 = shalt.err (!%p1097_p1)
}
 0x1fe   :  { %768 = dma.vmem_to_hbm [thread:$0]  %s766_s0, 64, %s1558_s14, [#allocation8]   ;;  %v676_v2 = vpop.permute.xlu0 %675 }
 0x1ff   :  { %s1157_s2 = smov [#allocation4]  }
 0x200   :  { %s745_s10 = sshll.u32 %s1157_s2, 4  ;;  %s746_s10 = int_to_ptr.vmem [resolvable:$true] %s745_s10 }
 0x201   :  { %s1101_s7 = scalar_lea.vmem %s746_s10, 256  ;;  %p1106_p3 = scmp.lt.s32.totalorder %s746_s10, %s746_s10 }
 0x202   :  { %p1102_p2 = scmp.ne.s32.totalorder %s746_s10, %s1101_s7  ;;  %p1107_p4 = scmp.lt.s32.totalorder %s1101_s7, %s1101_s7 }
 0x204   :  { %p1108_p5 = por %p1107_p4, %p1106_p3 }
 0x206   :  { %p1109_p6 = pnand %p1108_p5, %p1102_p2 }
 0x212   :  { %v665_v8 = vpop.f32.mrb[32].mxu0 }
 0x213   :  { %v678_v18 = vadd.f32 %v676_v2, %v665_v8  ;;  %670 = vst [vmem:[#allocation4] sm:$0xff] %v665_v8  ;;  %v667_v19 = vpop.f32.mrb[33].mxu0 }
 0x214   :  { %671 = vst [vmem:[#allocation4 + $0x8] sm:$0xff] %v667_v19  ;;  %v679_v26 = vadd.f32 %v676_v2, %v667_v19 }
 0x215   :  { %v680_v33 = vrot.slane %v678_v18, 4 }
 0x216   :  { %1112 = shalt.err (!%p1109_p6)
}
 0x217   :  { %s1113_s1 = scalar_lea.hbm %s1556_s12, 256 }
 0x218   :  { %p1114_p7 = scmp.ne.s32.totalorder %s1556_s12, %s1113_s1  ;;  %p1117_p8 = scmp.lt.u32.totalorder %s1113_s1, %s1556_s12 }
 0x21a   :  { %p1119_p9 = pnand %p1117_p8, %p1114_p7 }
 0x21c   :  { %1122 = shalt.err (!%p1119_p9)
}
 0x21d   :  { %748 = dma.vmem_to_hbm [thread:$0]  %s746_s10, 256, %s1556_s12, [#allocation5]   ;;  %v686_v44 = vrot.slane %v679_v26, 4  ;;  %v681_v53 = vmax.f32 %v678_v18, %v680_v33  ;;  %v1158_v57 = vmov 1966171168   ;;  %vm724_vm0 = vcmp.lt.s32.totalorder %v478_v40, 256 }
 0x21e   :  { %v708_v21 = vunpack.c.l.s4 %v1158_v57  ;;  %s1159_s12 = smov [#allocation6]  }
 0x21f   :  { %v687_v61 = vmax.f32 %v679_v26, %v686_v44  ;;  %v682_v63 = vrot.slane %v681_v53, 2  ;;  %s755_s27 = sshll.u32 %s1159_s12, 4  ;;  %s756_s27 = int_to_ptr.vmem [resolvable:$true] %s755_s27 }
 0x220   :  { %v709_v22 = vunpack.c.0.s8 %v708_v21  ;;  %s1123_s28 = scalar_lea.vmem %s756_s27, 32  ;;  %p1128_p11 = scmp.lt.s32.totalorder %s756_s27, %s756_s27 }
 0x221   :  { %v688_v0 = vrot.slane %v687_v61, 2  ;;  %v683_v1 = vmax.f32 %v681_v53, %v682_v63  ;;  %p1124_p10 = scmp.ne.s32.totalorder %s756_s27, %s1123_s28  ;;  %p1129_p12 = scmp.lt.s32.totalorder %s1123_s28, %s1123_s28 }
 0x222   :  { %v712_v24 = vsub.s32 %v709_v22, %v1393_v42 }
 0x223   :  { %v689_v4 = vmax.f32 %v687_v61, %v688_v0  ;;  %v684_v5 = vrot.slane %v683_v1, 1  ;;  %p1130_p13 = por %p1129_p12, %p1128_p11 }
 0x225   :  { %v690_v6 = vrot.slane %v689_v4, 1  ;;  %v685_v7 = vmax.f32 %v683_v1, %v684_v5  ;;  %p1131_p0 = pnand %p1130_p13, %p1124_p10 }
 0x227   :  { %v691_v9 = vmax.f32 %v689_v4, %v690_v6  ;;  %v692_v10 = vsub.f32 0.0, %v685_v7 }
 0x229   :  { %v693_v12 = vsub.f32 0.0, %v691_v9  ;;  %v694_v13 = vmul.f32 1.442695, %v692_v10 }
 0x22b   :  { %v696_v14 = vmul.f32 1.442695, %v693_v12  ;;  %1049 = vpow2.f32 %v694_v13 }
 0x22d   :  { %1051 = vpow2.f32 %v696_v14 }
 0x235   :  { %v1050_v15 = vpop.eup %1049 }
 0x236   :  { %v698_v17 = vadd.f32 1.0, %v1050_v15 }
 0x237   :  { %v1052_v16 = vpop.eup %1051 }
 0x238   :  { %v699_v20 = vadd.f32 1.0, %v1052_v16  ;;  %1053 = vrcp.f32 %v698_v17 }
 0x23a   :  { %1055 = vrcp.f32 %v699_v20 }
 0x242   :  { %v1054_v23 = vpop.eup %1053 }
 0x244   :  { %v1056_v25 = vpop.eup %1055 }
 0x245   :  { %v706_v27 = vcombine.low %v1054_v23, %v1056_v25 }
 0x247   :  { %v713_v28 = vrot.slane %v706_v27, %v712_v24 }
 0x249   :  { %v720_v29 = vrot.slane %v713_v28, %v712_v24 }
 0x24b   :  { %726 = vst.msk [vmem:[#allocation6] sm:$0x3] %vm724_vm0, %v720_v29 }
 0x24c   :  { %1134 = shalt.err (!%p1131_p0)
}
 0x24d   :  { %s1135_s15 = scalar_lea.hbm %s1557_s13, 32 }
 0x24e   :  { %p1136_p1 = scmp.ne.s32.totalorder %s1557_s13, %s1135_s15  ;;  %p1139_p2 = scmp.lt.u32.totalorder %s1135_s15, %s1557_s13 }
 0x250   :  { %p1141_p3 = pnand %p1139_p2, %p1136_p1 }
 0x252   :  { %1144 = shalt.err (!%p1141_p3)
}
 0x253   :  { %758 = dma.vmem_to_hbm [thread:$0]  %s756_s27, 32, %s1557_s13, [#allocation5]  }
 0x254   :  { %1145 = dma.done.wait [#allocation3], 4096  }
 0x255   :  { %1146 = vsyncadd [#allocation3], 4294963200 }
 0x256   :  { %1147 = dma.done.wait [#allocation5], 288  }
 0x257   :  { %1148 = vsyncadd [#allocation5], 4294967008 }
 0x258   :  { %1149 = dma.done.wait [#allocation8], 64  }
 0x259   :  { %1150 = vsyncadd [#allocation8], 4294967232 }
 0x25a   :  { %781 = vsyncpa [#allocation3], 1 }
 0x25b   :  { %782 = vsyncpa [#allocation5], 1 }
 0x25c   :  { %783 = vsyncpa [#allocation8], 1 }

</bundles_post_ra>
